<compile_context>
chip_gen: v6e
topology: v6e:2x2x1
jax: 0.10.0
libtpu: 0.0.40
codegen_flags: <defaults>
</compile_context>

<pallas_src>
import math
import functools

import jax
import jax.numpy as jnp
from jax import lax
from jax.experimental import pallas as pl
from jax.experimental.pallas import tpu as pltpu


def _gelu_tanh(x):
    # PyTorch nn.GELU(approximate='tanh')
    c = math.sqrt(2.0 / math.pi)
    return 0.5 * x * (1.0 + jnp.tanh(c * (x + 0.044715 * x * x * x)))


def _layernorm(x, w, b, eps=1e-5):
    # One-pass statistics: var = E[x^2] - mu^2 (clamped against cancellation).
    mu = jnp.mean(x, axis=-1, keepdims=True)
    ms = jnp.mean(x * x, axis=-1, keepdims=True)
    var = jnp.maximum(ms - mu * mu, 0.0)
    return (x - mu) * lax.rsqrt(var + eps) * w + b


# --------------------- kernel 1: LN1 + fused K/V projection (bf16 out) ----------------
def ln_kv_kernel(x_ref, ln1w_ref, ln1b_ref, wkv_ref, bkv_ref, kv_ref):
    x = x_ref[0].astype(jnp.float32)                                   # (tq, C)
    h = _layernorm(x, ln1w_ref[...].astype(jnp.float32),
                   ln1b_ref[...].astype(jnp.float32))
    hc = h.astype(wkv_ref.dtype)                                       # matmul operand dtype
    kv = jnp.dot(hc, wkv_ref[...], preferred_element_type=jnp.float32) \
        + bkv_ref[...].astype(jnp.float32)                             # (tq, 2C)
    kv_ref[0] = kv.astype(kv_ref.dtype)                                # bf16 store


# ------------- kernel 2: LN1+Q, attention, out-proj, residual, LN2, chunked MLP --------
def attn_mlp_kernel(x_ref, kv_ref, ln1w_ref, ln1b_ref, wq_ref, bq_ref,
                    wao_ref, bao_ref, ln2w_ref, ln2b_ref,
                    wfc_ref, bfc_ref, wpr_ref, bpr_ref,
                    o_ref, *, n_head, mlp_chunk):
    x = x_ref[0].astype(jnp.float32)                                   # (tq, C) residual
    tq, C = x.shape
    hd = C // n_head

    # LN1 + Q projection for this tile (1/sqrt(hd) folded into wq / bq).
    h1 = _layernorm(x, ln1w_ref[...].astype(jnp.float32),
                    ln1b_ref[...].astype(jnp.float32))
    q = jnp.dot(h1.astype(wq_ref.dtype), wq_ref[...],
                preferred_element_type=jnp.float32) \
        + bq_ref[...].astype(jnp.float32)                              # (tq, C)

    # Per-head attention. K/V are never materialized as full (T, C) values — each head
    # loads only a (T, hd) slice straight from the (bf16) ref. Softmax normalization is
    # deferred to the (tq, hd) head output.
    # TODO(synk): for large n_head, switch this unrolled loop to lax.fori_loop with a
    # VMEM scratch concat buffer to bound live ranges.
    kv_dtype = kv_ref.dtype
    heads = []
    for hh in range(n_head):
        sl = slice(hh * hd, (hh + 1) * hd)
        qh = q[:, sl].astype(kv_dtype)                                 # (tq, hd)
        kh = kv_ref[0, :, sl]                                          # (T, hd) bf16
        vh = kv_ref[0, :, slice(C + hh * hd, C + (hh + 1) * hd)]       # (T, hd) bf16
        # Contract the last dims directly: no explicit transpose of K.
        s = lax.dot_general(qh, kh, (((1,), (1,)), ((), ())),
                            preferred_element_type=jnp.float32)        # (tq, T)
        s = s - jnp.max(s, axis=-1, keepdims=True)
        p = jnp.exp(s)
        denom = jnp.sum(p, axis=-1, keepdims=True)                     # (tq, 1)
        oh = jnp.dot(p.astype(kv_dtype), vh,
                     preferred_element_type=jnp.float32)               # (tq, hd)
        oh = oh * pl.reciprocal(denom, approx=True)                    # deferred normalize
        heads.append(oh)

    attn = jnp.concatenate(heads, axis=-1)                             # (tq, C) f32
    y = jnp.dot(attn.astype(wao_ref.dtype), wao_ref[...],
                preferred_element_type=jnp.float32)                    # ONE K=C out-proj
    x1 = x + y + bao_ref[...].astype(jnp.float32)

    # MLP branch: LN2 then hidden-dim-chunked fc -> GELU -> proj with an f32 accumulator,
    # so the (tq, 4C) intermediate never materializes.
    # TODO(synk): for large 4C, convert to lax.fori_loop with pl.ds/pl.multiple_of slices.
    h2 = _layernorm(x1, ln2w_ref[...].astype(jnp.float32),
                    ln2b_ref[...].astype(jnp.float32))
    h2c = h2.astype(wfc_ref.dtype)
    H = wfc_ref.shape[1]
    mlp = jnp.zeros((tq, C), jnp.float32)
    for c0 in range(0, H, mlp_chunk):
        fc = jnp.dot(h2c, wfc_ref[:, c0:c0 + mlp_chunk],
                     preferred_element_type=jnp.float32)
        fc = fc + bfc_ref[:, c0:c0 + mlp_chunk].astype(jnp.float32)
        g = _gelu_tanh(fc)
        mlp = mlp + jnp.dot(g.astype(wpr_ref.dtype), wpr_ref[c0:c0 + mlp_chunk, :],
                            preferred_element_type=jnp.float32)

    out = x1 + mlp + bpr_ref[...].astype(jnp.float32)
    o_ref[0] = out.astype(o_ref.dtype)


# ------------------------------------- wrapper ----------------------------------------
def _device_kind():
    try:
        return jax.devices()[0].device_kind.lower()
    except Exception:
        return ""


def transformer_block(x, params, n_head, *, tq=None, mlp_chunk=None,
                      kv_dtype=jnp.bfloat16):
    B, T, C = x.shape
    assert C % n_head == 0
    hd = C // n_head
    H = 4 * C
    kind = _device_kind()

    if tq is None:
        # v6e: 256-wide MXU + 128 MiB VMEM -> larger query tile; v5e/v7x: 128.
        pref = 256 if ("v6" in kind and T % 256 == 0) else 128
        tq = T if T <= pref else pref
    assert T % tq == 0, "T must be divisible by the query tile size"
    n_tq = T // tq

    if mlp_chunk is None:
        mlp_chunk = H if H <= 512 else 512
    assert H % mlp_chunk == 0

    # Per-generation scoped-VMEM budget (headroom over the defaults; conservative on v7x
    # which only has 64 MiB per TensorCore).
    if "v6" in kind:
        vmem_limit = 96 * 1024 * 1024
    elif "v7" in kind:
        vmem_limit = 48 * 1024 * 1024
    elif "v5e" in kind or "v5 lite" in kind or "v5lite" in kind:
        vmem_limit = 64 * 1024 * 1024
    else:
        vmem_limit = 32 * 1024 * 1024

    # Split the fused QKV weight. Fold 1/sqrt(hd) into Q; keep K/V as one fused (C, 2C)
    # projection (its columns are contiguous in the original layout).
    scale = 1.0 / math.sqrt(hd)
    w_qkv, b_qkv = params["w_qkv"], params["b_qkv"]
    w_q = w_qkv[:, 0 * C:1 * C] * scale
    b_q = b_qkv[:, 0 * C:1 * C] * scale
    w_kv = w_qkv[:, 1 * C:3 * C]
    b_kv = b_qkv[:, 1 * C:3 * C]

    def rep(shape):
        n = len(shape)
        return pl.BlockSpec(shape, lambda b, i: (0,) * n)   # replicated (weights)

    # TODO(synk): single-buffer the grid-invariant weight / K-V blocks (pipeline_mode=
    # pl.Buffered(1)) and, for C >= 1024 on v7x, store w_fc/w_proj in bf16 and add an
    # "arbitrary" grid axis over the 4C hidden dim so only a (C, chunk) slab is resident.
    cparams = pltpu.CompilerParams(
        dimension_semantics=("parallel", "parallel"),   # B is the leading/megacore axis
        vmem_limit_bytes=vmem_limit,
    )

    x_tile_spec = pl.BlockSpec((1, tq, C), lambda b, i: (b, i, 0))
    kv_tile_spec = pl.BlockSpec((1, tq, 2 * C), lambda b, i: (b, i, 0))
    kv_seq_spec = pl.BlockSpec((1, T, 2 * C), lambda b, i: (b, 0, 0))  # constant over i

    # ---- kernel 1: LN1 + fused K/V projection, bf16 output ----
    kv = pl.pallas_call(
        ln_kv_kernel,
        out_shape=jax.ShapeDtypeStruct((B, T, 2 * C), kv_dtype),
        grid=(B, n_tq),
        in_specs=[
            x_tile_spec,
            rep(params["ln1_w"].shape), rep(params["ln1_b"].shape),
            rep((C, 2 * C)), rep((1, 2 * C)),
        ],
        out_specs=kv_tile_spec,
        compiler_params=cparams,
    )(x, params["ln1_w"], params["ln1_b"], w_kv, b_kv)

    # ---- kernel 2: LN1+Q, attention, out-proj, residual, LN2, chunked MLP ----
    kernel2 = functools.partial(attn_mlp_kernel, n_head=n_head, mlp_chunk=mlp_chunk)
    out = pl.pallas_call(
        kernel2,
        out_shape=jax.ShapeDtypeStruct((B, T, C), x.dtype),
        grid=(B, n_tq),
        in_specs=[
            x_tile_spec,                                  # x (residual / LN1 input)
            kv_seq_spec,                                  # K|V, full sequence, bf16
            rep(params["ln1_w"].shape), rep(params["ln1_b"].shape),
            rep((C, C)), rep((1, C)),                     # Q proj (scale folded)
            rep((C, C)), rep((1, C)),                     # attn out-proj
            rep(params["ln2_w"].shape), rep(params["ln2_b"].shape),
            rep((C, H)), rep((1, H)),                     # mlp fc
            rep((H, C)), rep((1, C)),                     # mlp proj
        ],
        out_specs=x_tile_spec,
        compiler_params=cparams,
    )(x, kv,
      params["ln1_w"], params["ln1_b"], w_q, b_q,
      params["w_attn_proj"], params["b_attn_proj"],
      params["ln2_w"], params["ln2_b"],
      params["w_fc"], params["b_fc"],
      params["w_proj"], params["b_proj"])
    return out


# ---------------- pure-JAX reference (for correctness check) ----------------
def block_reference(x, params, n_head):
    B, T, C = x.shape
    hd = C // n_head

    def ln(h, w, b):
        mu = jnp.mean(h, axis=-1, keepdims=True)
        var = jnp.mean((h - mu) ** 2, axis=-1, keepdims=True)
        return (h - mu) / jnp.sqrt(var + 1e-5) * w + b

    h = ln(x, params["ln1_w"], params["ln1_b"])
    qkv = h @ params["w_qkv"] + params["b_qkv"]
    q, k, v = jnp.split(qkv, 3, axis=-1)
    q = q.reshape(B, T, n_head, hd).transpose(0, 2, 1, 3)
    k = k.reshape(B, T, n_head, hd).transpose(0, 2, 1, 3)
    v = v.reshape(B, T, n_head, hd).transpose(0, 2, 1, 3)
    att = jnp.einsum("bhtd,bhsd->bhts", q, k) / math.sqrt(hd)
    att = jax.nn.softmax(att, axis=-1)
    o = jnp.einsum("bhts,bhsd->bhtd", att, v).transpose(0, 2, 1, 3).reshape(B, T, C)
    o = o @ params["w_attn_proj"] + params["b_attn_proj"]
    x = x + o

    h2 = ln(x, params["ln2_w"], params["ln2_b"])
    fc = h2 @ params["w_fc"] + params["b_fc"]
    g = 0.5 * fc * (1.0 + jnp.tanh(math.sqrt(2.0 / math.pi) * (fc + 0.044715 * fc ** 3)))
    mlp = g @ params["w_proj"] + params["b_proj"]
    return x + mlp


def init_params(key, n_embd):
    C = n_embd
    ks = jax.random.split(key, 4)
    std = 0.02
    return {
        "ln1_w": jnp.ones((1, C), jnp.float32),
        "ln1_b": jnp.zeros((1, C), jnp.float32),
        # weights stored as (in, out) == PyTorch W.T
        "w_qkv": std * jax.random.normal(ks[0], (C, 3 * C), jnp.float32),
        "b_qkv": jnp.zeros((1, 3 * C), jnp.float32),
        "w_attn_proj": std * jax.random.normal(ks[1], (C, C), jnp.float32),
        "b_attn_proj": jnp.zeros((1, C), jnp.float32),
        "ln2_w": jnp.ones((1, C), jnp.float32),
        "ln2_b": jnp.zeros((1, C), jnp.float32),
        "w_fc": std * jax.random.normal(ks[2], (C, 4 * C), jnp.float32),
        "b_fc": jnp.zeros((1, 4 * C), jnp.float32),
        "w_proj": std * jax.random.normal(ks[3], (4 * C, C), jnp.float32),
        "b_proj": jnp.zeros((1, C), jnp.float32),
    }


if __name__ == "__main__":
    B, T, C, n_head = 2, 16, 32, 4
    key = jax.random.PRNGKey(0)
    kx, kp = jax.random.split(key)
    x = jax.random.normal(kx, (B, T, C), jnp.float32)
    params = init_params(kp, C)

    # tq=8 / mlp_chunk=64 exercise the sequence-tile grid axis and the MLP hidden chunking.
    out = transformer_block(x, params, n_head, tq=8, mlp_chunk=64)
    out = jax.block_until_ready(out)

    ref = block_reference(x, params, n_head)
    assert out.shape == (B, T, C)
    err = float(jnp.max(jnp.abs(out - ref)))
    # Tolerance accounts for the bf16 K/V round trip and the EUP approximate reciprocal.
    assert jnp.allclose(out, ref, atol=5e-3, rtol=5e-3), err
    print("KERNEL_OK")
</pallas_src>

<mosaic_0001>
module attributes {stable_mosaic.version = 11 : i64} {
  func.func @ln_kv_kernel(%arg0: i32, %arg1: i32, %arg2: memref<1x8x32xf32, #tpu.memory_space<vmem>>, %arg3: memref<1x32xf32, #tpu.memory_space<vmem>>, %arg4: memref<1x32xf32, #tpu.memory_space<vmem>>, %arg5: memref<32x64xf32, #tpu.memory_space<vmem>>, %arg6: memref<1x64xf32, #tpu.memory_space<vmem>>, %arg7: memref<1x8x64xbf16, #tpu.memory_space<vmem>>) attributes {dimension_semantics = [#tpu.dimension_semantics<parallel>, #tpu.dimension_semantics<parallel>], iteration_bounds = array<i64: 2, 2>, scalar_prefetch = 0 : i64, scratch_operands = 0 : i64, tpu.core_type = #tpu.core_type<tc>, window_params = [{transform_indices = @transform_0, window_bounds = array<i64: 1, 8, 32>}, {pipeline_mode = #tpu.pipeline_mode<synchronous>, transform_indices = @transform_1, window_bounds = array<i64: 1, 32>}, {pipeline_mode = #tpu.pipeline_mode<synchronous>, transform_indices = @transform_2, window_bounds = array<i64: 1, 32>}, {pipeline_mode = #tpu.pipeline_mode<synchronous>, transform_indices = @transform_3, window_bounds = array<i64: 32, 64>}, {pipeline_mode = #tpu.pipeline_mode<synchronous>, transform_indices = @transform_4, window_bounds = array<i64: 1, 64>}, {transform_indices = @transform_5, window_bounds = array<i64: 1, 8, 64>}]} {
    %c0 = arith.constant 0 : index
    %c0_0 = arith.constant 0 : index
    %c0_1 = arith.constant 0 : index
    %0 = vector.load %arg2[%c0, %c0_0, %c0_1] : memref<1x8x32xf32, #tpu.memory_space<vmem>>, vector<1x8x32xf32>
    %1 = vector.shape_cast %0 : vector<1x8x32xf32> to vector<8x32xf32>
    %c0_2 = arith.constant 0 : index
    %c0_3 = arith.constant 0 : index
    %2 = vector.load %arg3[%c0_2, %c0_3] : memref<1x32xf32, #tpu.memory_space<vmem>>, vector<1x32xf32>
    %c0_4 = arith.constant 0 : index
    %c0_5 = arith.constant 0 : index
    %3 = vector.load %arg4[%c0_4, %c0_5] : memref<1x32xf32, #tpu.memory_space<vmem>>, vector<1x32xf32>
    %cst = arith.constant dense<0.000000e+00> : vector<8xf32>
    %4 = vector.multi_reduction <add>, %1, %cst [1] : vector<8x32xf32> to vector<8xf32>
    %5 = vector.shape_cast %4 : vector<8xf32> to vector<8x1xf32>
    %cst_6 = arith.constant 3.200000e+01 : f32
    %6 = vector.broadcast %cst_6 : f32 to vector<8x1xf32>
    %7 = arith.divf %5, %6 : vector<8x1xf32>
    %8 = arith.mulf %1, %1 : vector<8x32xf32>
    %cst_7 = arith.constant dense<0.000000e+00> : vector<8xf32>
    %9 = vector.multi_reduction <add>, %8, %cst_7 [1] : vector<8x32xf32> to vector<8xf32>
    %10 = vector.shape_cast %9 : vector<8xf32> to vector<8x1xf32>
    %cst_8 = arith.constant 3.200000e+01 : f32
    %11 = vector.broadcast %cst_8 : f32 to vector<8x1xf32>
    %12 = arith.divf %10, %11 : vector<8x1xf32>
    %13 = arith.mulf %7, %7 : vector<8x1xf32>
    %14 = arith.subf %12, %13 : vector<8x1xf32>
    %cst_9 = arith.constant 0.000000e+00 : f32
    %15 = vector.broadcast %cst_9 : f32 to vector<8x1xf32>
    %16 = arith.maximumf %14, %15 : vector<8x1xf32>
    %17 = vector.broadcast %7 : vector<8x1xf32> to vector<8x32xf32>
    %18 = arith.subf %1, %17 : vector<8x32xf32>
    %cst_10 = arith.constant 9.99999974E-6 : f32
    %19 = vector.broadcast %cst_10 : f32 to vector<8x1xf32>
    %20 = arith.addf %16, %19 : vector<8x1xf32>
    %21 = math.rsqrt %20 : vector<8x1xf32>
    %22 = vector.broadcast %21 : vector<8x1xf32> to vector<8x32xf32>
    %23 = arith.mulf %18, %22 : vector<8x32xf32>
    %24 = vector.broadcast %2 : vector<1x32xf32> to vector<8x32xf32>
    %25 = arith.mulf %23, %24 : vector<8x32xf32>
    %26 = vector.broadcast %3 : vector<1x32xf32> to vector<8x32xf32>
    %27 = arith.addf %25, %26 : vector<8x32xf32>
    %c0_11 = arith.constant 0 : index
    %c0_12 = arith.constant 0 : index
    %28 = vector.load %arg5[%c0_11, %c0_12] : memref<32x64xf32, #tpu.memory_space<vmem>>, vector<32x64xf32>
    %cst_13 = arith.constant dense<0.000000e+00> : vector<8x64xf32>
    %29 = tpu.matmul %27, %28, %cst_13 {dimension_numbers = #tpu.dot_dimension_numbers<[1], [0], [0], [1], [0, 0, 1, 1], [], []>} : vector<8x32xf32>, vector<32x64xf32>, vector<8x64xf32> -> vector<8x64xf32>
    %c0_14 = arith.constant 0 : index
    %c0_15 = arith.constant 0 : index
    %30 = vector.load %arg6[%c0_14, %c0_15] : memref<1x64xf32, #tpu.memory_space<vmem>>, vector<1x64xf32>
    %31 = vector.broadcast %30 : vector<1x64xf32> to vector<8x64xf32>
    %32 = arith.addf %29, %31 : vector<8x64xf32>
    %33 = arith.truncf %32 : vector<8x64xf32> to vector<8x64xbf16>
    %c0_16 = arith.constant 0 : index
    %c0_17 = arith.constant 0 : index
    %c0_18 = arith.constant 0 : index
    %34 = vector.load %arg7[%c0_16, %c0_17, %c0_18] : memref<1x8x64xbf16, #tpu.memory_space<vmem>>, vector<1x8x64xbf16>
    %35 = vector.shape_cast %34 : vector<1x8x64xbf16> to vector<8x64xbf16>
    %36 = vector.shape_cast %33 : vector<8x64xbf16> to vector<1x8x64xbf16>
    tpu.vector_store %arg7[%c0_16, %c0_17, %c0_18], %36 {strides = array<i32>} : memref<1x8x64xbf16, #tpu.memory_space<vmem>>, vector<1x8x64xbf16>,
    return
  }
  func.func @transform_0(%arg0: i32, %arg1: i32) -> (i32, i32, i32) {
    %c0_i32 = arith.constant 0 : i32
    %c0_i32_0 = arith.constant 0 : i32
    return %arg0, %arg1, %c0_i32 : i32, i32, i32
  }
  func.func @transform_1(%arg0: i32, %arg1: i32) -> (i32, i32) {
    %c0_i32 = arith.constant 0 : i32
    %c0_i32_0 = arith.constant 0 : i32
    %c0_i32_1 = arith.constant 0 : i32
    return %c0_i32, %c0_i32_0 : i32, i32
  }
  func.func @transform_2(%arg0: i32, %arg1: i32) -> (i32, i32) {
    %c0_i32 = arith.constant 0 : i32
    %c0_i32_0 = arith.constant 0 : i32
    %c0_i32_1 = arith.constant 0 : i32
    return %c0_i32, %c0_i32_0 : i32, i32
  }
  func.func @transform_3(%arg0: i32, %arg1: i32) -> (i32, i32) {
    %c0_i32 = arith.constant 0 : i32
    %c0_i32_0 = arith.constant 0 : i32
    %c0_i32_1 = arith.constant 0 : i32
    return %c0_i32, %c0_i32_0 : i32, i32
  }
  func.func @transform_4(%arg0: i32, %arg1: i32) -> (i32, i32) {
    %c0_i32 = arith.constant 0 : i32
    %c0_i32_0 = arith.constant 0 : i32
    %c0_i32_1 = arith.constant 0 : i32
    return %c0_i32, %c0_i32_0 : i32, i32
  }
  func.func @transform_5(%arg0: i32, %arg1: i32) -> (i32, i32, i32) {
    %c0_i32 = arith.constant 0 : i32
    %c0_i32_0 = arith.constant 0 : i32
    return %arg0, %arg1, %c0_i32 : i32, i32, i32
  }
}

</mosaic_0001>

<bundles_post_ra>
// kernel: tpu_custom_call.1
= control target key start
LH: loop header
LB: loop body
LE: loop exit
PB: predicated region body
PF: predicated region fallthrough
CT: control target
= control target key end

     0   :  { %s1027_s0 = inlined_call_operand.hbm [shape: f32[2,16,32], index: 0, kind: input, shape index: {}]   ;;  %s1028_s1 = inlined_call_operand.vmem [shape: f32[1,32], index: 1, kind: input, shape index: {}]   ;;  %s1029_s2 = inlined_call_operand.vmem [shape: f32[1,32], index: 2, kind: input, shape index: {}]   ;;  %s1030_s3 = inlined_call_operand.hbm [shape: f32[32,64], index: 3, kind: input, shape index: {}]   ;;  %s1031_s4 = inlined_call_operand.vmem [shape: f32[1,64], index: 4, kind: input, shape index: {}]   ;;  %s1032_s5 = inlined_call_operand.hbm [shape: bf16[2,16,64], index: 5, kind: output, shape index: {}]  }
   0x1   :  { %1040 = sst [smem:[#allocation15_spill]] %s1030_s3 }
   0x2   :  { %1041 = sst [smem:[#allocation16_spill]] %s1031_s4 }
   0x3   :  { %1042 = sst [smem:[#allocation17_spill]] %s1032_s5 }
   0x4   :  { %10 = vsyncpa [#allocation3], 0 }
   0x5   :  { %12 = vsyncpa [#allocation3 + $0x1], 0 }
   0x6   :  { %13 = vsyncpa [#allocation6], 0 }
   0x7   :  { %14 = vsyncpa [#allocation4], 0 }
   0x8   :  { %16 = vsyncpa [#allocation4 + $0x1], 0  ;;  %s831_s18 = smov 0   ;;  %s833_s19 = smov 0  }
   0x9   :  { %s835_s20 = smov 0   ;;  %s837_s21 = smov 0  }
   0xa   :  { %s839_s22 = smov 0   ;;  %s841_s23 = smov 0  }
   0xb   :  { %s843_s24 = smov 0   ;;  %s845_s25 = smov 0  }
   0xc LB: > { %1043 = sst [smem:[#allocation11_spill]] %s764_s18  ;;  %s506_s26 = sadd.s32 4294967295, %s792_s25   ;;  %s792_s25 = sphi %s845_s25, %s22_s25   ;;  %s788_s24 = sphi %s843_s24, %s1070_s24   ;;  %s784_s23 = sphi %s841_s23, %s1069_s23   ;;  %s780_s22 = sphi %s839_s22, %s1068_s22   ;;  %s776_s21 = sphi %s837_s21, %s1067_s21   ;;  %s772_s20 = sphi %s835_s20, %s1066_s20   ;;  %s768_s19 = sphi %s833_s19, %s1065_s19   ;;  %s764_s18 = sphi %s831_s18, %s1064_s18  }
   0xd   : > { %s507_s27 = sadd.s32 4294967294, %s792_s25   ;;  %p56_p0 = scmp.ne.s32.totalorder %s768_s19, %s764_s18 }
   0xe   : > { %p875_p1 = scmp.eq.s32.totalorder %s506_s26, 0  ;;  %p879_p2 = scmp.eq.s32.totalorder %s506_s26, 3 }
   0xf   : > { %p172_p3 = scmp.eq.s32.totalorder %s507_s27, 3  ;;  %p508_p5 = scmp.ge.s32.totalorder %s792_s25, 1 }
  0x10   : > { %p885_p4 = por %p875_p1, %p56_p0  ;;  %p179_p7 = scmp.lt.s32.totalorder %s792_s25, 5 }
  0x11   : > { %p890_p6 = por %p172_p3, %p56_p0  ;;  %s794_s8 = smov [#allocation5]  }
  0x12   : > { %s1046_s30 = scalar_select %p885_p4, 1, 0 }
  0x13   : > { %s1047_s6 = scalar_select %p890_p6, 1, 0 }
  0x14   : > { %p895_p8 = pnand %p508_p5, %p179_p7  ;;  %s197_s9 = sshll.u32 %s794_s8, 4  ;;  %s198_s9 = int_to_ptr.vmem [resolvable:$true] %s197_s9 }
  0x15   : > { %1048 = sst [smem:[#allocation12_spill]] %s1047_s6  ;;  %s649_s10 = scalar_lea.vmem %s198_s9, 512 }
  0x16   : > { %p551_p9 = pneg %p895_p8  ;;  %p650_p12 = scmp.ne.s32.totalorder %s198_s9, %s649_s10 }
  0x17   : > { %p657_p3 = scmp.lt.s32.totalorder %s198_s9, %s198_s9  ;;  %p658_p6 = scmp.lt.s32.totalorder %s649_s10, %s649_s10 }
  0x18   : > { %p552_p10 = pnand %p551_p9, %p875_p1 }
  0x19   : > { %p659_p4 = por %p658_p6, %p657_p3 }
  0x1a   : > { %p640_p11 = pneg %p552_p10 }
  0x1c   : > { %p652_p13 = pnand %p650_p12, %p640_p11 }
  0x1e   : > { %p653_p0 = pneg %p652_p13 }
  0x20   : > { %p660_p5 = pnand %p659_p4, %p653_p0 }
  0x22   : > { %663 = shalt.err (!%p660_p5)
}
  0x23   : > { %s795_s11 = smov 128   ;;  %s796_s12 = smov 8  }
  0x24   : > { %s1050_s3 = sld [smem:[#allocation15_spill]]  ;;  %s31_s15 = sadd.s32 1, %s784_s23 }
  0x25   : > { %p32_p4 = scmp.ge.s32.totalorder %s31_s15, 2  ;;  %s34_s16 = sadd.s32 1, %s788_s24 }
  0x26   : > { %s43_s17 = sadd.s32 1, %s772_s20  ;;  %p50_p6 = scmp.ne.s32.totalorder %s772_s20, %s768_s19 }
  0x27   : > { %s1072_s15 = smov (%p32_p4, %s31_s15), 0  ;;  %s1074_s16 = smov (!%p32_p4, %s34_s16), %s788_s24 }
  0x28   : > { %1051 = sst [smem:[#allocation13_spill]] %s1072_s15  ;;  %s39_s26 = ssub.s32 %s784_s23, %s1072_s15 }
  0x29   : > { %p51_p7 = scmp.eq.s32.totalorder %s792_s25, 0  ;;  %p36_p9 = scmp.ge.s32.totalorder %s1074_s16, 2 }
  0x2a   : > { %554 = dma.hbm_to_vmem [thread:$0]  (!%p552_p10), %s1050_s3, 512, %s198_s9, [#allocation6], %s795_s11, %s795_s11, %s796_s12  }
  0x2b   : > { %p919_p11 = por %p879_p2, %p50_p6  ;;  %p923_p10 = por %p51_p7, %p50_p6 }
  0x2c   : > { %p564_p12 = scmp.lt.s32.totalorder %s792_s25, 4  ;;  %s1076_s16 = smov (%p36_p9, %s1074_s16), 0 }
  0x2d   : > { %s1052_s27 = scalar_select %p919_p11, 1, 0 }
  0x2e   : > { %s214_s9 = sand.u32 1, %s772_s20   ;;  %s512_s10 = sshll.u32 %s788_s24, 1 }
  0x2f   : > { %1053 = sst [smem:[#allocation14_spill]] %s1052_s27  ;;  %s38_s11 = ssub.s32 %s788_s24, %s1076_s16 }
  0x30   : > { %s40_s12 = sor.u32 %s39_s26, %s38_s11  ;;  %s511_s13 = sshll.u32 %s214_s9, 3 }
  0x31   : > { %p41_p13 = scmp.eq.s32.totalorder %s40_s12, 0  ;;  %s223_s29 = sadd.s32 %s784_s23, %s512_s10 }
  0x32   : > { %s218_s14 = scalar_lea.vmem [#allocation2], %s511_s13  ;;  %s513_s6 = sshll.u32 %s223_s29, 7 }
  0x33   : > { %s227_s3 = sshll.u32 %s218_s14, 4  ;;  %s225_s27 = scalar_lea.hbm %s1027_s0, %s513_s6  ;;  %s228_s3 = int_to_ptr.vmem [resolvable:$true] %s227_s3 }
  0x34   : > { %s936_s15 = scalar_select %p41_p13, %s772_s20, %s43_s17  }
  0x35   : > { %p945_p2 = pnand %p564_p12, %p923_p10  ;;  %s215_s26 = scalar_lea.sflag [#allocation3], %s214_s9 }
  0x36   : > { %s677_s10 = scalar_lea.vmem %s228_s3, 128  ;;  %s797_s17 = smov [#allocation2]  }
  0x37   : > { %p666_p0 = pneg %p945_p2  ;;  %p678_p3 = scmp.ne.s32.totalorder %s228_s3, %s677_s10 }
  0x38   : > { %s682_s11 = sshll.u32 %s797_s17, 4  ;;  %s683_s11 = int_to_ptr.vmem [resolvable:$false] %s682_s11 }
  0x39   : > { %p680_p5 = pnand %p678_p3, %p666_p0  ;;  %s684_s12 = scalar_lea.vmem %s683_s11, 256 }
  0x3a   : > { %p685_p6 = scmp.lt.s32.totalorder %s228_s3, %s683_s11  ;;  %p686_p7 = scmp.lt.s32.totalorder %s684_s12, %s677_s10 }
  0x3b   : > { %p681_p4 = pneg %p680_p5 }
  0x3c   : > { %p687_p9 = por %p686_p7, %p685_p6 }
  0x3e   : > { %p688_p13 = pnand %p687_p9, %p681_p4 }
  0x40   : > { %691 = shalt.err (!%p688_p13)
}
  0x41   : > { %558 = dma.hbm_to_vmem [thread:$0]  (!%p945_p2), %s225_s27, 128, %s228_s3, %s215_s26  }
  0x42   : > { %236 = sbr.rel (%p895_p8) target bundleno = 456 (0x1c8), region = 40  ;;  %s956_s5 = sand.u32 (!%p895_p8), 1, %s768_s19  }
  0x43   : > { %s515_s18 = sshll.u32 (!%p895_p8), %s956_s5, 3  ;;  %s239_s6 = scalar_lea.sflag (!%p895_p8), [#allocation3], %s956_s5 }
  0x44   : > { %s242_s8 = scalar_lea.vmem (!%p895_p8), [#allocation2], %s515_s18  ;;  %p1056_p10 = scmp.ne.s32.totalorder (!%p895_p8), %s1046_s30, 0 }
  0x47   : > { %751 = dma.done.wait (%p1056_p10), %s239_s6, 128  }
  0x48   : > { %753 = vsyncadd (%p1056_p10), %s239_s6, 4294967168 }
  0x49   : > { %755 = dma.done.wait (%p875_p1), [#allocation6], 512  }
  0x4a   : > { %757 = vsyncadd (%p875_p1), [#allocation6], 4294966784  ;;  %vm276_vm0 = vcmask 261120   ;;  %v273_v0 = vld [vmem:[%s242_s8] sm:$0xff]  ;;  %v798_v5 = vmov 0.0   ;;  %vm799_vm1 = vmmov 0  }
  0x4b   : > { %v277_v1 = vsel %vm276_vm0, %v273_v0, 0.0  ;;  %v282_v2 = vmul.f32 %v273_v0, %v273_v0  ;;  %v311_v4 = vld [vmem:[#allocation5 + $0x18] sm:$0xff]  ;;  %532 = vmatprep.subr.mxu0 %v798_v5  ;;  %v310_v6 = vld [vmem:[#allocation5 + $0x10] sm:$0xff]  ;;  %540 = vmatprep.mubr.msk.f32.mxu0 %vm799_vm1, %v798_v5  ;;  %v309_v7 = vld [vmem:[#allocation5 + $0x8] sm:$0xff]  ;;  %s517_s7 = sshll.u32 %s956_s5, 2  ;;  %s523_s27 = sshll.u32 %s780_s22, 1 }
  0x4c   : > { %278 = vadd.xlane.f32.xlu0 %v277_v1  ;;  %533 = vmatpush3.msra.mxu0 %v311_v4  ;;  %v308_v8 = vld [vmem:[#allocation5] sm:$0xff]  ;;  %v518_v19 = vld [vmem:[%s1028_s1] ss:$0 sm:$0xff]  ;;  %s407_s9 = sadd.s32 %s776_s21, %s523_s27  ;;  %s1057_s14 = sld [smem:[#allocation16_spill]]  ;;  %vm393_vm2 = vcmask 519168  }
  0x4d   : > { %v283_v3 = vsel %vm276_vm0, %v282_v2, 0.0  ;;  %534 = vmatprep.subr.mxu0 %v798_v5  ;;  %v519_v21 = vld [vmem:[%s1029_s2] ss:$0 sm:$0xff]  ;;  %s524_s10 = sshll.u32 %s407_s9, 6  ;;  %s272_s17 = scalar_lea.vmem [#allocation7], %s517_s7 }
  0x4e   : > { %535 = vmatpush3.msra.mxu0 %v310_v6  ;;  %s411_s11 = sshll.u32 %s272_s17, 4  ;;  %s1059_s6 = sld [smem:[#allocation17_spill]]  ;;  %s412_s11 = int_to_ptr.vmem [resolvable:$true] %s411_s11 }
  0x4f   : > { %536 = vmatprep.subr.mxu0 %v798_v5  ;;  %s396_s21 = scalar_lea.sflag [#allocation4], %s956_s5  ;;  %s692_s22 = scalar_lea.vmem %s412_s11, 64 }
  0x50   : > { %284 = vadd.xlane.f32.xlu0 %v283_v3  ;;  %537 = vmatpush3.msra.mxu0 %v309_v7  ;;  %p693_p1 = scmp.ne.s32.totalorder %s412_s11, %s692_s22  ;;  %s800_s3 = smov [#allocation7]  }
  0x51   : > { %538 = vmatprep.subr.mxu0 %v798_v5  ;;  %s696_s4 = sshll.u32 %s800_s3, 4  ;;  %s697_s4 = int_to_ptr.vmem [resolvable:$false] %s696_s4 }
  0x52   : > { %539 = vmatpush3.msra.mxu0 %v308_v8  ;;  %v520_v24 = vld [vmem:[%s1057_s14] ss:$0 sm:$0xff]  ;;  %p694_p8 = pnand %p693_p1, %p919_p11  ;;  %s698_s28 = scalar_lea.vmem %s697_s4, 128 }
  0x53   : > { %p699_p2 = scmp.lt.s32.totalorder %s412_s11, %s697_s4  ;;  %p700_p0 = scmp.lt.s32.totalorder %s698_s28, %s692_s22 }
  0x54   : > { %s409_s8 = scalar_lea.hbm %s1059_s6, %s524_s10  ;;  %p695_p12 = pneg %p694_p8 }
  0x55   : > { %p701_p3 = por %p700_p0, %p699_p2 }
  0x57   : > { %p702_p5 = pnand %p701_p3, %p695_p12 }
  0xd5   : > { %v279_v9 = vpop.xlane.xlu0 %278 }
  0xd6   : > { %v281_v10 = vmul.f32 0.03125, %v279_v9 }
  0xd8   : > { %v287_v12 = vmul.f32 %v281_v10, %v281_v10  ;;  %v290_v17 = vsub.f32 %v273_v0, %v281_v10 }
  0xd9   : > { %v285_v11 = vpop.xlane.xlu0 %284 }
  0xda   : > { %v286_v13 = vmul.f32 0.03125, %v285_v11 }
  0xdc   : > { %v288_v14 = vsub.f32 %v286_v13, %v287_v12 }
  0xde   : > { %v289_v15 = vmax.f32 %v288_v14, 0.0 }
  0xe0   : > { %v291_v16 = vadd.f32 1e-05, %v289_v15 }
  0xe2   : > { %636 = vrsqrt.f32 %v291_v16 }
  0xef   : > { %v637_v18 = vpop.eup %636 }
  0xf0   : > { %v293_v20 = vmul.f32 %v637_v18, %v290_v17 }
  0xf2   : > { %v300_v22 = vmul.f32 %v518_v19, %v293_v20 }
  0xf4   : > { %v307_v23 = vadd.f32 %v519_v21, %v300_v22 }
  0xf6   : > { %541 = vmatmul.mubr.msk.f32.vlgmr.msra.gmra.mxu0 %vm276_vm0, %v307_v23 }
 0x1b6   : > { %v388_v25 = vpop.f32.mrf.mxu0 }
 0x1b7   : > { %v389_v26 = vadd.f32 %v520_v24, %v388_v25 }
 0x1b8   : > { %v542_v27 = vpop.f32.mrf.mxu0 }
 0x1b9   : > { %v392_v28 = vpack.c.bf16 %v389_v26, %v389_v26 }
 0x1bb   : > { %394 = vst.msk [vmem:[%s272_s17] sm:$0xf] %vm393_vm2, %v392_v28 }
 0x1bc   : > { %705 = shalt.err (!%p702_p5)
}
 0x1bd   : > { %s706_s30 = scalar_lea.hbm %s409_s8, 64  ;;  %s710_s27 = scalar_lea.hbm %s1059_s6, 256 }
 0x1be   : > { %p707_p4 = scmp.ne.s32.totalorder %s409_s8, %s706_s30  ;;  %p711_p9 = scmp.lt.s32.totalorder %s409_s8, %s1059_s6 }
 0x1bf   : > { %p712_p13 = scmp.lt.s32.totalorder %s710_s27, %s706_s30 }
 0x1c0   : > { %p708_p6 = pnand %p707_p4, %p919_p11 }
 0x1c1   : > { %p713_p10 = por %p712_p13, %p711_p9 }
 0x1c2   : > { %p709_p7 = pneg %p708_p6 }
 0x1c4   : > { %p714_p1 = pnand %p713_p10, %p709_p7 }
 0x1c6   : > { %717 = shalt.err (!%p714_p1)
}
 0x1c7   : > { %549 = dma.vmem_to_hbm [thread:$0]  (%p919_p11), %s412_s11, 64, %s409_s8, %s396_s21  }
 0x1c8 PF: > { %s1060_s29 = sld [smem:[#allocation11_spill]]  ;;  %p566_p8 = scmp.ge.s32.totalorder %s792_s25, 2 }
 0x1c9   : > { %s1061_s14 = sld [smem:[#allocation12_spill]] }
 0x1ce   : > { %s423_s10 = sand.u32 1, %s1060_s29  }
 0x1cf   : > { %p1062_p12 = scmp.ne.s32.totalorder %s1061_s14, 0  ;;  %s424_s17 = scalar_lea.sflag [#allocation4], %s423_s10 }
 0x1d1   : > { %p560_p2 = pnand %p566_p8, %p1062_p12 }
 0x1d3   : > { %p561_p0 = pneg %p560_p2 }
 0x1d5   : > { %759 = dma.done.wait (%p561_p0), %s424_s17, 64  }
 0x1d6   : > { %761 = vsyncadd (%p561_p0), %s424_s17, 4294967232  ;;  %s22_s25 = sadd.s32 1, %s792_s25   ;;  %s1063_s26 = sld [smem:[#allocation13_spill]] }
 0x1d7   : > { %p19_p3 = scmp.ge.s32.totalorder %s22_s25, 6   ;;  %s1064_s18 = smov %s768_s19 }
 0x1d8   : > { %s1065_s19 = smov %s772_s20  ;;  %s1066_s20 = smov %s936_s15 }
 0x1d9   : > { %s1067_s21 = smov %s784_s23  ;;  %s1068_s22 = smov %s788_s24 }
 0x1da   : > { %s1070_s24 = smov %s1076_s16  ;;  %21 = sbr.rel (!%p19_p3) target bundleno = 12 (0xc), region = 89 }
 0x1dc   : > { %s1069_s23 = smov %s1063_s26 }
 0x1df   :  { %429 = vsyncpa [#allocation3], 1 }
 0x1e0   :  { %431 = vsyncpa [#allocation3 + $0x1], 1 }
 0x1e1   :  { %432 = vsyncpa [#allocation6], 1 }
 0x1e2   :  { %433 = vsyncpa [#allocation4], 1 }
 0x1e3   :  { %435 = vsyncpa [#allocation4 + $0x1], 1 }

</bundles_post_ra>
